<compile_context>
chip_gen: v7x
topology: tpu7x:2x2x1
jax: 0.10.0
libtpu: 0.0.40
codegen_flags: <defaults>
</compile_context>

<pallas_src>
import functools

import jax
import jax.numpy as jnp
from jax.experimental import pallas as pl
from jax.experimental.pallas import tpu as pltpu


def _round_up(n, m):
    return ((n + m - 1) // m) * m


# --------------------------------------------------------------------------
# Kernel body: full forward for one batch tile.
# refs layout: x, label, wc, bc, w0x, w0c, b0, (w_i, b_i)*(layer_num-1),
#              wf_gate, bf_gate, wf_dz, bf_dz, out
# All weights are [in, out] bf16 (pre-transposed, padded); biases [1, out] f32.
# --------------------------------------------------------------------------
def _actor_kernel(layer_num, *refs):
    it = iter(refs)
    x_ref = next(it)
    label_ref = next(it)
    wc_ref = next(it)
    bc_ref = next(it)
    w0x_ref = next(it)
    w0c_ref = next(it)
    b0_ref = next(it)
    hidden = [(next(it), next(it)) for _ in range(layer_num - 1)]
    wg_ref = next(it)
    bg_ref = next(it)
    wd_ref = next(it)
    bd_ref = next(it)
    out_ref = next(it)

    x = x_ref[...].astype(jnp.float32)           # [tb, d_zp], kept for gating
    x_bf = x.astype(jnp.bfloat16)
    label = label_ref[...].astype(jnp.bfloat16)  # [tb, n_lp], one-hot -> exact

    # condition_layer(label) = label @ Wc + bc   (Wc already transposed)
    cond = (jnp.dot(label, wc_ref[...], preferred_element_type=jnp.float32)
            + bc_ref[...])

    # fw_layer[0] on concat([x, cond], -1) == x @ W0x + cond @ W0c + b0
    h = (jnp.dot(x_bf, w0x_ref[...], preferred_element_type=jnp.float32)
         + jnp.dot(cond.astype(jnp.bfloat16), w0c_ref[...],
                   preferred_element_type=jnp.float32)
         + b0_ref[...])
    h = jnp.maximum(h, 0.0).astype(jnp.bfloat16)

    # fw_layer[1..layer_num-1]: Linear + ReLU
    for w_ref, b_ref in hidden:
        h = jnp.dot(h, w_ref[...], preferred_element_type=jnp.float32) + b_ref[...]
        h = jnp.maximum(h, 0.0).astype(jnp.bfloat16)

    # final Linear split into gate / dz halves (no in-kernel lane slicing)
    gate_pre = (jnp.dot(h, wg_ref[...], preferred_element_type=jnp.float32)
                + bg_ref[...])
    dz = (jnp.dot(h, wd_ref[...], preferred_element_type=jnp.float32)
          + bd_ref[...])

    # sigmoid via EUP exp + approx EUP reciprocal (VALU-friendly)
    gate = pl.reciprocal(1.0 + jnp.exp(-gate_pre), approx=True)
    # (1 - g)*x + g*dz == x + g*(dz - x)   (one fewer multiply)
    out_ref[...] = (x + gate * (dz - x)).astype(out_ref.dtype)


# --------------------------------------------------------------------------
# Parameter construction (PyTorch-style Linear init, PyTorch layout).
# --------------------------------------------------------------------------
def init_actor_params(key, d_z, d_model, layer_num, num_label):
    def linear(k, in_dim, out_dim):
        kw, kb = jax.random.split(k)
        bound = 1.0 / float(in_dim) ** 0.5
        w = jax.random.uniform(kw, (out_dim, in_dim), jnp.float32, -bound, bound)
        b = jax.random.uniform(kb, (1, out_dim), jnp.float32, -bound, bound)
        return w, b

    keys = jax.random.split(key, layer_num + 2)
    wc, bc = linear(keys[0], num_label, d_model)              # condition_layer
    w0, b0 = linear(keys[1], d_z + d_model, d_model)          # fw_layer[0]
    w0x, w0c = w0[:, :d_z], w0[:, d_z:]                       # split for concat-free matmul
    hidden = [linear(keys[1 + i], d_model, d_model)
              for i in range(1, layer_num)]                   # fw_layer[1..]
    wf, bf = linear(keys[layer_num + 1], d_model, d_z * 2)    # final Linear
    return {
        "wc": wc, "bc": bc,
        "w0x": w0x, "w0c": w0c, "b0": b0,
        "hidden": hidden,
        "wf": wf, "bf": bf,
    }


def pack_actor_params(params, d_z, d_model, num_label):
    """Host-side: transpose to [in, out], pad to 128 multiples, cast to bf16."""
    d_zp = _round_up(d_z, 128)
    d_mp = _round_up(d_model, 128)
    n_lp = _round_up(num_label, 128)

    def wpad(w, rows, cols):
        wt = jnp.asarray(w).T                                  # [in, out]
        wt = jnp.pad(wt, ((0, rows - wt.shape[0]), (0, cols - wt.shape[1])))
        return wt.astype(jnp.bfloat16)

    def bpad(b, cols):
        b = jnp.asarray(b).astype(jnp.float32)
        return jnp.pad(b, ((0, 0), (0, cols - b.shape[1])))

    flat = [wpad(params["wc"], n_lp, d_mp), bpad(params["bc"], d_mp),
            wpad(params["w0x"], d_zp, d_mp), wpad(params["w0c"], d_mp, d_mp),
            bpad(params["b0"], d_mp)]
    for w, b in params["hidden"]:
        flat += [wpad(w, d_mp, d_mp), bpad(b, d_mp)]
    wf, bf = params["wf"], params["bf"]
    wf_gate, wf_dz = wf[:d_z, :], wf[d_z:, :]                  # rows = outputs
    bf_gate, bf_dz = bf[:, :d_z], bf[:, d_z:]
    flat += [wpad(wf_gate, d_mp, d_zp), bpad(bf_gate, d_zp),
             wpad(wf_dz, d_mp, d_zp), bpad(bf_dz, d_zp)]
    return flat


# --------------------------------------------------------------------------
# Wrapper: pad activations, build grid/BlockSpecs, call the kernel.
# --------------------------------------------------------------------------
def actor_forward(x, label, packed, layer_num):
    B, d_z = x.shape
    num_label = label.shape[1]
    n_lp, d_mp = packed[0].shape        # wc padded: [n_lp, d_mp]
    d_zp = packed[2].shape[0]           # w0x padded: [d_zp, d_mp]

    # Batch tiling: 256-row tiles for big batches (matches v6e/v7x MXU rows),
    # otherwise one sublane-aligned tile covering the whole batch.
    tb = 256 if B >= 256 else _round_up(B, 8)
    Bp = _round_up(B, tb)

    x_p = jnp.zeros((Bp, d_zp), x.dtype).at[:B, :d_z].set(x)
    l_p = jnp.zeros((Bp, n_lp), label.dtype).at[:B, :num_label].set(label)

    act_spec = pl.BlockSpec((tb, d_zp), lambda i: (i, 0))
    lbl_spec = pl.BlockSpec((tb, n_lp), lambda i: (i, 0))
    # Weights/biases: full-array blocks, constant block index -> stay resident.
    w_specs = [pl.BlockSpec(p.shape, lambda i: (0, 0)) for p in packed]

    weight_bytes = sum(int(p.size) * p.dtype.itemsize for p in packed)
    block_bytes = 2 * tb * d_zp * x.dtype.itemsize + tb * n_lp * label.dtype.itemsize
    vmem_limit = int(min(100 * 2**20,
                         max(32 * 2**20, 2 * (weight_bytes + block_bytes) + (4 << 20))))

    # Advisory cost estimate for XLA's scheduler.
    d_model = d_mp
    flops = 2 * Bp * (n_lp * d_mp + d_zp * d_mp + d_mp * d_mp
                      + (layer_num - 1) * d_mp * d_mp + 2 * d_mp * d_zp)
    cost = pl.CostEstimate(
        flops=int(flops),
        transcendentals=int(Bp * d_zp),
        bytes_accessed=int(weight_bytes + (Bp // tb) * block_bytes),
    )

    kernel = functools.partial(_actor_kernel, layer_num)

    out_p = pl.pallas_call(
        kernel,
        out_shape=jax.ShapeDtypeStruct((Bp, d_zp), x.dtype),
        grid_spec=pltpu.PrefetchScalarGridSpec(
            num_scalar_prefetch=0,
            grid=(Bp // tb,),
            in_specs=[act_spec, lbl_spec] + w_specs,
            out_specs=act_spec,
        ),
        input_output_aliases={0: 0},     # new_z overwrites the padded-x buffer
        compiler_params=pltpu.CompilerParams(
            dimension_semantics=("parallel",),
            vmem_limit_bytes=vmem_limit,
        ),
        cost_estimate=cost,
    )(x_p, l_p, *packed)

    return out_p[:B, :d_z]


# --------------------------------------------------------------------------
# Pure-JAX f32 reference mirroring the PyTorch forward, for verification.
# --------------------------------------------------------------------------
def actor_reference(x, label, params):
    cond = label @ params["wc"].T + params["bc"]
    h = jnp.concatenate([x, cond], axis=-1)
    w0 = jnp.concatenate([params["w0x"], params["w0c"]], axis=-1)
    h = jnp.maximum(h @ w0.T + params["b0"], 0.0)
    for w, b in params["hidden"]:
        h = jnp.maximum(h @ w.T + b, 0.0)
    out = h @ params["wf"].T + params["bf"]
    d_z = x.shape[-1]
    input_gate, dz = out[:, :d_z], out[:, d_z:]
    gate = jax.nn.sigmoid(input_gate)
    return (1.0 - gate) * x + gate * dz


if __name__ == "__main__":
    # Small shapes consistent with the module (d_model shrunk from 2048).
    B, d_z, d_model, layer_num, num_label = 2, 32, 64, 4, 10

    key = jax.random.PRNGKey(0)
    kx, kl, kp = jax.random.split(key, 3)
    x = jax.random.normal(kx, (B, d_z), jnp.float32)
    label_ids = jax.random.randint(kl, (B,), 0, num_label)
    label = jax.nn.one_hot(label_ids, num_label, dtype=jnp.float32)

    params = init_actor_params(kp, d_z, d_model, layer_num, num_label)
    packed = pack_actor_params(params, d_z, d_model, num_label)

    fwd = jax.jit(actor_forward, static_argnums=(3,))
    out = jax.block_until_ready(fwd(x, label, packed, layer_num))

    ref = actor_reference(x, label, params)
    assert out.shape == (B, d_z)
    # bf16 weights/activations (f32 accumulation) + approx reciprocal sigmoid
    # -> loosened tolerance vs f32 reference.
    assert jnp.allclose(out, ref, atol=5e-2, rtol=5e-2), "mismatch vs JAX reference"

    print("KERNEL_OK")
</pallas_src>

<mosaic_0001>
module attributes {stable_mosaic.version = 11 : i64} {
  func.func @_actor_kernel(%arg0: i32, %arg1: memref<8x128xf32, #tpu.memory_space<vmem>>, %arg2: memref<8x128xf32, #tpu.memory_space<vmem>>, %arg3: memref<128x128xbf16, #tpu.memory_space<vmem>>, %arg4: memref<1x128xf32, #tpu.memory_space<vmem>>, %arg5: memref<128x128xbf16, #tpu.memory_space<vmem>>, %arg6: memref<128x128xbf16, #tpu.memory_space<vmem>>, %arg7: memref<1x128xf32, #tpu.memory_space<vmem>>, %arg8: memref<128x128xbf16, #tpu.memory_space<vmem>>, %arg9: memref<1x128xf32, #tpu.memory_space<vmem>>, %arg10: memref<128x128xbf16, #tpu.memory_space<vmem>>, %arg11: memref<1x128xf32, #tpu.memory_space<vmem>>, %arg12: memref<128x128xbf16, #tpu.memory_space<vmem>>, %arg13: memref<1x128xf32, #tpu.memory_space<vmem>>, %arg14: memref<128x128xbf16, #tpu.memory_space<vmem>>, %arg15: memref<1x128xf32, #tpu.memory_space<vmem>>, %arg16: memref<128x128xbf16, #tpu.memory_space<vmem>>, %arg17: memref<1x128xf32, #tpu.memory_space<vmem>>, %arg18: memref<8x128xf32, #tpu.memory_space<vmem>>) attributes {dimension_semantics = [#tpu.dimension_semantics<parallel>], iteration_bounds = array<i64: 1>, scalar_prefetch = 0 : i64, scratch_operands = 0 : i64, tpu.core_type = #tpu.core_type<tc>, window_params = [{transform_indices = @transform_0, window_bounds = array<i64: 8, 128>}, {transform_indices = @transform_1, window_bounds = array<i64: 8, 128>}, {pipeline_mode = #tpu.pipeline_mode<synchronous>, transform_indices = @transform_2, window_bounds = array<i64: 128, 128>}, {pipeline_mode = #tpu.pipeline_mode<synchronous>, transform_indices = @transform_3, window_bounds = array<i64: 1, 128>}, {pipeline_mode = #tpu.pipeline_mode<synchronous>, transform_indices = @transform_4, window_bounds = array<i64: 128, 128>}, {pipeline_mode = #tpu.pipeline_mode<synchronous>, transform_indices = @transform_5, window_bounds = array<i64: 128, 128>}, {pipeline_mode = #tpu.pipeline_mode<synchronous>, transform_indices = @transform_6, window_bounds = array<i64: 1, 128>}, {pipeline_mode = #tpu.pipeline_mode<synchronous>, transform_indices = @transform_7, window_bounds = array<i64: 128, 128>}, {pipeline_mode = #tpu.pipeline_mode<synchronous>, transform_indices = @transform_8, window_bounds = array<i64: 1, 128>}, {pipeline_mode = #tpu.pipeline_mode<synchronous>, transform_indices = @transform_9, window_bounds = array<i64: 128, 128>}, {pipeline_mode = #tpu.pipeline_mode<synchronous>, transform_indices = @transform_10, window_bounds = array<i64: 1, 128>}, {pipeline_mode = #tpu.pipeline_mode<synchronous>, transform_indices = @transform_11, window_bounds = array<i64: 128, 128>}, {pipeline_mode = #tpu.pipeline_mode<synchronous>, transform_indices = @transform_12, window_bounds = array<i64: 1, 128>}, {pipeline_mode = #tpu.pipeline_mode<synchronous>, transform_indices = @transform_13, window_bounds = array<i64: 128, 128>}, {pipeline_mode = #tpu.pipeline_mode<synchronous>, transform_indices = @transform_14, window_bounds = array<i64: 1, 128>}, {pipeline_mode = #tpu.pipeline_mode<synchronous>, transform_indices = @transform_15, window_bounds = array<i64: 128, 128>}, {pipeline_mode = #tpu.pipeline_mode<synchronous>, transform_indices = @transform_16, window_bounds = array<i64: 1, 128>}, {transform_indices = @transform_17, window_bounds = array<i64: 8, 128>}]} {
    %c0 = arith.constant 0 : index
    %c0_0 = arith.constant 0 : index
    %0 = vector.load %arg1[%c0, %c0_0] : memref<8x128xf32, #tpu.memory_space<vmem>>, vector<8x128xf32>
    %1 = arith.truncf %0 : vector<8x128xf32> to vector<8x128xbf16>
    %c0_1 = arith.constant 0 : index
    %c0_2 = arith.constant 0 : index
    %2 = vector.load %arg2[%c0_1, %c0_2] : memref<8x128xf32, #tpu.memory_space<vmem>>, vector<8x128xf32>
    %3 = arith.truncf %2 : vector<8x128xf32> to vector<8x128xbf16>
    %c0_3 = arith.constant 0 : index
    %c0_4 = arith.constant 0 : index
    %4 = vector.load %arg3[%c0_3, %c0_4] : memref<128x128xbf16, #tpu.memory_space<vmem>>, vector<128x128xbf16>
    %cst = arith.constant dense<0.000000e+00> : vector<8x128xf32>
    %5 = tpu.matmul %3, %4, %cst {dimension_numbers = #tpu.dot_dimension_numbers<[1], [0], [0], [1], [0, 0, 1, 1], [], []>} : vector<8x128xbf16>, vector<128x128xbf16>, vector<8x128xf32> -> vector<8x128xf32>
    %c0_5 = arith.constant 0 : index
    %c0_6 = arith.constant 0 : index
    %6 = vector.load %arg4[%c0_5, %c0_6] : memref<1x128xf32, #tpu.memory_space<vmem>>, vector<1x128xf32>
    %7 = vector.broadcast %6 : vector<1x128xf32> to vector<8x128xf32>
    %8 = arith.addf %5, %7 : vector<8x128xf32>
    %c0_7 = arith.constant 0 : index
    %c0_8 = arith.constant 0 : index
    %9 = vector.load %arg5[%c0_7, %c0_8] : memref<128x128xbf16, #tpu.memory_space<vmem>>, vector<128x128xbf16>
    %cst_9 = arith.constant dense<0.000000e+00> : vector<8x128xf32>
    %10 = tpu.matmul %1, %9, %cst_9 {dimension_numbers = #tpu.dot_dimension_numbers<[1], [0], [0], [1], [0, 0, 1, 1], [], []>} : vector<8x128xbf16>, vector<128x128xbf16>, vector<8x128xf32> -> vector<8x128xf32>
    %11 = arith.truncf %8 : vector<8x128xf32> to vector<8x128xbf16>
    %c0_10 = arith.constant 0 : index
    %c0_11 = arith.constant 0 : index
    %12 = vector.load %arg6[%c0_10, %c0_11] : memref<128x128xbf16, #tpu.memory_space<vmem>>, vector<128x128xbf16>
    %cst_12 = arith.constant dense<0.000000e+00> : vector<8x128xf32>
    %13 = tpu.matmul %11, %12, %cst_12 {dimension_numbers = #tpu.dot_dimension_numbers<[1], [0], [0], [1], [0, 0, 1, 1], [], []>} : vector<8x128xbf16>, vector<128x128xbf16>, vector<8x128xf32> -> vector<8x128xf32>
    %14 = arith.addf %10, %13 : vector<8x128xf32>
    %c0_13 = arith.constant 0 : index
    %c0_14 = arith.constant 0 : index
    %15 = vector.load %arg7[%c0_13, %c0_14] : memref<1x128xf32, #tpu.memory_space<vmem>>, vector<1x128xf32>
    %16 = vector.broadcast %15 : vector<1x128xf32> to vector<8x128xf32>
    %17 = arith.addf %14, %16 : vector<8x128xf32>
    %cst_15 = arith.constant 0.000000e+00 : f32
    %18 = vector.broadcast %cst_15 : f32 to vector<8x128xf32>
    %19 = arith.maximumf %17, %18 : vector<8x128xf32>
    %20 = arith.truncf %19 : vector<8x128xf32> to vector<8x128xbf16>
    %c0_16 = arith.constant 0 : index
    %c0_17 = arith.constant 0 : index
    %21 = vector.load %arg8[%c0_16, %c0_17] : memref<128x128xbf16, #tpu.memory_space<vmem>>, vector<128x128xbf16>
    %cst_18 = arith.constant dense<0.000000e+00> : vector<8x128xf32>
    %22 = tpu.matmul %20, %21, %cst_18 {dimension_numbers = #tpu.dot_dimension_numbers<[1], [0], [0], [1], [0, 0, 1, 1], [], []>} : vector<8x128xbf16>, vector<128x128xbf16>, vector<8x128xf32> -> vector<8x128xf32>
    %c0_19 = arith.constant 0 : index
    %c0_20 = arith.constant 0 : index
    %23 = vector.load %arg9[%c0_19, %c0_20] : memref<1x128xf32, #tpu.memory_space<vmem>>, vector<1x128xf32>
    %24 = vector.broadcast %23 : vector<1x128xf32> to vector<8x128xf32>
    %25 = arith.addf %22, %24 : vector<8x128xf32>
    %cst_21 = arith.constant 0.000000e+00 : f32
    %26 = vector.broadcast %cst_21 : f32 to vector<8x128xf32>
    %27 = arith.maximumf %25, %26 : vector<8x128xf32>
    %28 = arith.truncf %27 : vector<8x128xf32> to vector<8x128xbf16>
    %c0_22 = arith.constant 0 : index
    %c0_23 = arith.constant 0 : index
    %29 = vector.load %arg10[%c0_22, %c0_23] : memref<128x128xbf16, #tpu.memory_space<vmem>>, vector<128x128xbf16>
    %cst_24 = arith.constant dense<0.000000e+00> : vector<8x128xf32>
    %30 = tpu.matmul %28, %29, %cst_24 {dimension_numbers = #tpu.dot_dimension_numbers<[1], [0], [0], [1], [0, 0, 1, 1], [], []>} : vector<8x128xbf16>, vector<128x128xbf16>, vector<8x128xf32> -> vector<8x128xf32>
    %c0_25 = arith.constant 0 : index
    %c0_26 = arith.constant 0 : index
    %31 = vector.load %arg11[%c0_25, %c0_26] : memref<1x128xf32, #tpu.memory_space<vmem>>, vector<1x128xf32>
    %32 = vector.broadcast %31 : vector<1x128xf32> to vector<8x128xf32>
    %33 = arith.addf %30, %32 : vector<8x128xf32>
    %cst_27 = arith.constant 0.000000e+00 : f32
    %34 = vector.broadcast %cst_27 : f32 to vector<8x128xf32>
    %35 = arith.maximumf %33, %34 : vector<8x128xf32>
    %36 = arith.truncf %35 : vector<8x128xf32> to vector<8x128xbf16>
    %c0_28 = arith.constant 0 : index
    %c0_29 = arith.constant 0 : index
    %37 = vector.load %arg12[%c0_28, %c0_29] : memref<128x128xbf16, #tpu.memory_space<vmem>>, vector<128x128xbf16>
    %cst_30 = arith.constant dense<0.000000e+00> : vector<8x128xf32>
    %38 = tpu.matmul %36, %37, %cst_30 {dimension_numbers = #tpu.dot_dimension_numbers<[1], [0], [0], [1], [0, 0, 1, 1], [], []>} : vector<8x128xbf16>, vector<128x128xbf16>, vector<8x128xf32> -> vector<8x128xf32>
    %c0_31 = arith.constant 0 : index
    %c0_32 = arith.constant 0 : index
    %39 = vector.load %arg13[%c0_31, %c0_32] : memref<1x128xf32, #tpu.memory_space<vmem>>, vector<1x128xf32>
    %40 = vector.broadcast %39 : vector<1x128xf32> to vector<8x128xf32>
    %41 = arith.addf %38, %40 : vector<8x128xf32>
    %cst_33 = arith.constant 0.000000e+00 : f32
    %42 = vector.broadcast %cst_33 : f32 to vector<8x128xf32>
    %43 = arith.maximumf %41, %42 : vector<8x128xf32>
    %44 = arith.truncf %43 : vector<8x128xf32> to vector<8x128xbf16>
    %c0_34 = arith.constant 0 : index
    %c0_35 = arith.constant 0 : index
    %45 = vector.load %arg14[%c0_34, %c0_35] : memref<128x128xbf16, #tpu.memory_space<vmem>>, vector<128x128xbf16>
    %cst_36 = arith.constant dense<0.000000e+00> : vector<8x128xf32>
    %46 = tpu.matmul %44, %45, %cst_36 {dimension_numbers = #tpu.dot_dimension_numbers<[1], [0], [0], [1], [0, 0, 1, 1], [], []>} : vector<8x128xbf16>, vector<128x128xbf16>, vector<8x128xf32> -> vector<8x128xf32>
    %c0_37 = arith.constant 0 : index
    %c0_38 = arith.constant 0 : index
    %47 = vector.load %arg15[%c0_37, %c0_38] : memref<1x128xf32, #tpu.memory_space<vmem>>, vector<1x128xf32>
    %48 = vector.broadcast %47 : vector<1x128xf32> to vector<8x128xf32>
    %49 = arith.addf %46, %48 : vector<8x128xf32>
    %c0_39 = arith.constant 0 : index
    %c0_40 = arith.constant 0 : index
    %50 = vector.load %arg16[%c0_39, %c0_40] : memref<128x128xbf16, #tpu.memory_space<vmem>>, vector<128x128xbf16>
    %cst_41 = arith.constant dense<0.000000e+00> : vector<8x128xf32>
    %51 = tpu.matmul %44, %50, %cst_41 {dimension_numbers = #tpu.dot_dimension_numbers<[1], [0], [0], [1], [0, 0, 1, 1], [], []>} : vector<8x128xbf16>, vector<128x128xbf16>, vector<8x128xf32> -> vector<8x128xf32>
    %c0_42 = arith.constant 0 : index
    %c0_43 = arith.constant 0 : index
    %52 = vector.load %arg17[%c0_42, %c0_43] : memref<1x128xf32, #tpu.memory_space<vmem>>, vector<1x128xf32>
    %53 = vector.broadcast %52 : vector<1x128xf32> to vector<8x128xf32>
    %54 = arith.addf %51, %53 : vector<8x128xf32>
    %cst_44 = arith.constant 0.000000e+00 : f32
    %55 = vector.broadcast %cst_44 : f32 to vector<8x128xf32>
    %56 = arith.subf %55, %49 : vector<8x128xf32>
    %57 = math.exp %56 : vector<8x128xf32>
    %cst_45 = arith.constant 1.000000e+00 : f32
    %58 = vector.broadcast %cst_45 : f32 to vector<8x128xf32>
    %59 = arith.addf %58, %57 : vector<8x128xf32>
    %60 = tpu.reciprocal %59 {approx = true} : vector<8x128xf32> -> vector<8x128xf32>
    %61 = arith.subf %54, %0 : vector<8x128xf32>
    %62 = arith.mulf %60, %61 : vector<8x128xf32>
    %63 = arith.addf %0, %62 : vector<8x128xf32>
    %c0_46 = arith.constant 0 : index
    %c0_47 = arith.constant 0 : index
    %64 = vector.load %arg18[%c0_46, %c0_47] : memref<8x128xf32, #tpu.memory_space<vmem>>, vector<8x128xf32>
    tpu.vector_store %arg18[%c0_46, %c0_47], %63 {strides = array<i32>} : memref<8x128xf32, #tpu.memory_space<vmem>>, vector<8x128xf32>,
    return
  }
  func.func @transform_0(%arg0: i32) -> (i32, i32) {
    %c0_i32 = arith.constant 0 : i32
    %c0_i32_0 = arith.constant 0 : i32
    return %arg0, %c0_i32 : i32, i32
  }
  func.func @transform_1(%arg0: i32) -> (i32, i32) {
    %c0_i32 = arith.constant 0 : i32
    %c0_i32_0 = arith.constant 0 : i32
    return %arg0, %c0_i32 : i32, i32
  }
  func.func @transform_2(%arg0: i32) -> (i32, i32) {
    %c0_i32 = arith.constant 0 : i32
    %c0_i32_0 = arith.constant 0 : i32
    %c0_i32_1 = arith.constant 0 : i32
    return %c0_i32, %c0_i32_0 : i32, i32
  }
  func.func @transform_3(%arg0: i32) -> (i32, i32) {
    %c0_i32 = arith.constant 0 : i32
    %c0_i32_0 = arith.constant 0 : i32
    %c0_i32_1 = arith.constant 0 : i32
    return %c0_i32, %c0_i32_0 : i32, i32
  }
  func.func @transform_4(%arg0: i32) -> (i32, i32) {
    %c0_i32 = arith.constant 0 : i32
    %c0_i32_0 = arith.constant 0 : i32
    %c0_i32_1 = arith.constant 0 : i32
    return %c0_i32, %c0_i32_0 : i32, i32
  }
  func.func @transform_5(%arg0: i32) -> (i32, i32) {
    %c0_i32 = arith.constant 0 : i32
    %c0_i32_0 = arith.constant 0 : i32
    %c0_i32_1 = arith.constant 0 : i32
    return %c0_i32, %c0_i32_0 : i32, i32
  }
  func.func @transform_6(%arg0: i32) -> (i32, i32) {
    %c0_i32 = arith.constant 0 : i32
    %c0_i32_0 = arith.constant 0 : i32
    %c0_i32_1 = arith.constant 0 : i32
    return %c0_i32, %c0_i32_0 : i32, i32
  }
  func.func @transform_7(%arg0: i32) -> (i32, i32) {
    %c0_i32 = arith.constant 0 : i32
    %c0_i32_0 = arith.constant 0 : i32
    %c0_i32_1 = arith.constant 0 : i32
    return %c0_i32, %c0_i32_0 : i32, i32
  }
  func.func @transform_8(%arg0: i32) -> (i32, i32) {
    %c0_i32 = arith.constant 0 : i32
    %c0_i32_0 = arith.constant 0 : i32
    %c0_i32_1 = arith.constant 0 : i32
    return %c0_i32, %c0_i32_0 : i32, i32
  }
  func.func @transform_9(%arg0: i32) -> (i32, i32) {
    %c0_i32 = arith.constant 0 : i32
    %c0_i32_0 = arith.constant 0 : i32
    %c0_i32_1 = arith.constant 0 : i32
    return %c0_i32, %c0_i32_0 : i32, i32
  }
  func.func @transform_10(%arg0: i32) -> (i32, i32) {
    %c0_i32 = arith.constant 0 : i32
    %c0_i32_0 = arith.constant 0 : i32
    %c0_i32_1 = arith.constant 0 : i32
    return %c0_i32, %c0_i32_0 : i32, i32
  }
  func.func @transform_11(%arg0: i32) -> (i32, i32) {
    %c0_i32 = arith.constant 0 : i32
    %c0_i32_0 = arith.constant 0 : i32
    %c0_i32_1 = arith.constant 0 : i32
    return %c0_i32, %c0_i32_0 : i32, i32
  }
  func.func @transform_12(%arg0: i32) -> (i32, i32) {
    %c0_i32 = arith.constant 0 : i32
    %c0_i32_0 = arith.constant 0 : i32
    %c0_i32_1 = arith.constant 0 : i32
    return %c0_i32, %c0_i32_0 : i32, i32
  }
  func.func @transform_13(%arg0: i32) -> (i32, i32) {
    %c0_i32 = arith.constant 0 : i32
    %c0_i32_0 = arith.constant 0 : i32
    %c0_i32_1 = arith.constant 0 : i32
    return %c0_i32, %c0_i32_0 : i32, i32
  }
  func.func @transform_14(%arg0: i32) -> (i32, i32) {
    %c0_i32 = arith.constant 0 : i32
    %c0_i32_0 = arith.constant 0 : i32
    %c0_i32_1 = arith.constant 0 : i32
    return %c0_i32, %c0_i32_0 : i32, i32
  }
  func.func @transform_15(%arg0: i32) -> (i32, i32) {
    %c0_i32 = arith.constant 0 : i32
    %c0_i32_0 = arith.constant 0 : i32
    %c0_i32_1 = arith.constant 0 : i32
    return %c0_i32, %c0_i32_0 : i32, i32
  }
  func.func @transform_16(%arg0: i32) -> (i32, i32) {
    %c0_i32 = arith.constant 0 : i32
    %c0_i32_0 = arith.constant 0 : i32
    %c0_i32_1 = arith.constant 0 : i32
    return %c0_i32, %c0_i32_0 : i32, i32
  }
  func.func @transform_17(%arg0: i32) -> (i32, i32) {
    %c0_i32 = arith.constant 0 : i32
    %c0_i32_0 = arith.constant 0 : i32
    return %arg0, %c0_i32 : i32, i32
  }
}

</mosaic_0001>

<bundles_post_ra>
// kernel: actor_forward.1
= control target key start
LH: loop header
LB: loop body
LE: loop exit
PB: predicated region body
PF: predicated region fallthrough
CT: control target
= control target key end

     0   :  { %s1975_s0 = inlined_call_operand.vmem [shape: f32[8,128], index: 0, kind: input, shape index: {}, may-alias: {0,17}]   ;;  %s1976_s1 = inlined_call_operand.vmem [shape: f32[8,128], index: 1, kind: input, shape index: {}]   ;;  %s1977_s2 = inlined_call_operand.hbm [shape: bf16[128,128], index: 2, kind: input, shape index: {}]   ;;  %s1978_s3 = inlined_call_operand.vmem [shape: f32[1,128], index: 3, kind: input, shape index: {}]   ;;  %s1979_s4 = inlined_call_operand.hbm [shape: bf16[128,128], index: 4, kind: input, shape index: {}]   ;;  %s1980_s5 = inlined_call_operand.hbm [shape: bf16[128,128], index: 5, kind: input, shape index: {}]   ;;  %s1981_s6 = inlined_call_operand.vmem [shape: f32[1,128], index: 6, kind: input, shape index: {}]   ;;  %s1982_s7 = inlined_call_operand.hbm [shape: bf16[128,128], index: 7, kind: input, shape index: {}]   ;;  %s1983_s8 = inlined_call_operand.vmem [shape: f32[1,128], index: 8, kind: input, shape index: {}]   ;;  %s1984_s9 = inlined_call_operand.hbm [shape: bf16[128,128], index: 9, kind: input, shape index: {}]   ;;  %s1985_s10 = inlined_call_operand.vmem [shape: f32[1,128], index: 10, kind: input, shape index: {}]   ;;  %s1986_s11 = inlined_call_operand.hbm [shape: bf16[128,128], index: 11, kind: input, shape index: {}]   ;;  %s1987_s12 = inlined_call_operand.vmem [shape: f32[1,128], index: 12, kind: input, shape index: {}]   ;;  %s1988_s13 = inlined_call_operand.vmem [shape: bf16[128,128], index: 13, kind: input, shape index: {}]   ;;  %s1989_s14 = inlined_call_operand.vmem [shape: f32[1,128], index: 14, kind: input, shape index: {}]   ;;  %s1990_s15 = inlined_call_operand.hbm [shape: bf16[128,128], index: 15, kind: input, shape index: {}]   ;;  %s1991_s16 = inlined_call_operand.vmem [shape: f32[1,128], index: 16, kind: input, shape index: {}]   ;;  %s1992_s17 = inlined_call_operand.vmem [shape: f32[8,128], index: 17, kind: output, shape index: {}, may-alias: {0,17}]  }
   0x1   :  { %1993 = sst [smem:[#allocation17_spill]] %s1975_s0 }
   0x2   :  { %1994 = sst [smem:[#allocation18_spill]] %s1976_s1 }
   0x3   :  { %22 = vsyncpa [#allocation3], 0 }
   0x4   :  { %23 = vsyncpa [#allocation5], 0 }
   0x5   :  { %24 = vsyncpa [#allocation8], 0 }
   0x6   :  { %25 = vsyncpa [#allocation11], 0  ;;  %s1608_s24 = smov [#allocation4]   ;;  %s1609_s26 = smov [#allocation7]  }
   0x7   :  { %s49_s25 = sshll.u32 %s1608_s24, 4  ;;  %s75_s27 = sshll.u32 %s1609_s26, 4  ;;  %s50_s25 = int_to_ptr.vmem [resolvable:$true] %s49_s25  ;;  %s1709_s27 = int_to_ptr.vmem [resolvable:$true] %s75_s27 }
   0x8   :  { %s1446_s0 = scalar_lea.hbm %s1979_s4, 1024 }
   0x9   :  { %p1447_p0 = scmp.ne.s32.totalorder %s1979_s4, %s1446_s0  ;;  %p1450_p1 = scmp.lt.u32.totalorder %s1446_s0, %s1979_s4 }
   0xb   :  { %p1452_p2 = pnand %p1450_p1, %p1447_p0 }
   0xd   :  { %1455 = shalt.err (!%p1452_p2)
}
   0xe   :  { %s1456_s20 = scalar_lea.vmem %s50_s25, 1024  ;;  %p1461_p4 = scmp.lt.s32.totalorder %s50_s25, %s50_s25 }
   0xf   :  { %p1457_p3 = scmp.ne.s32.totalorder %s50_s25, %s1456_s20  ;;  %p1462_p5 = scmp.lt.s32.totalorder %s1456_s20, %s1456_s20 }
  0x11   :  { %p1463_p6 = por %p1462_p5, %p1461_p4 }
  0x13   :  { %p1464_p7 = pnand %p1463_p6, %p1457_p3 }
  0x15   :  { %1467 = shalt.err (!%p1464_p7)
}
  0x16   :  { %s1610_s21 = smov 64   ;;  %s1611_s22 = smov 4  }
  0x17   :  { %55 = dma.hbm_to_vmem [thread:$0]  %s1979_s4, 1024, %s50_s25, [#allocation5], %s1610_s21, %s1610_s21, %s1611_s22  }
  0x18   :  { %s1468_s29 = scalar_lea.hbm %s1982_s7, 1024 }
  0x19   :  { %p1469_p8 = scmp.ne.s32.totalorder %s1982_s7, %s1468_s29  ;;  %p1472_p9 = scmp.lt.u32.totalorder %s1468_s29, %s1982_s7 }
  0x1b   :  { %p1474_p10 = pnand %p1472_p9, %p1469_p8 }
  0x1d   :  { %1477 = shalt.err (!%p1474_p10)
}
  0x1e   :  { %s1478_s1 = scalar_lea.vmem %s1709_s27, 1024  ;;  %p1483_p12 = scmp.lt.s32.totalorder %s1709_s27, %s1709_s27 }
  0x1f   :  { %p1479_p11 = scmp.ne.s32.totalorder %s1709_s27, %s1478_s1  ;;  %p1484_p13 = scmp.lt.s32.totalorder %s1478_s1, %s1478_s1 }
  0x21   :  { %p1485_p0 = por %p1484_p13, %p1483_p12 }
  0x23   :  { %p1486_p1 = pnand %p1485_p0, %p1479_p11 }
  0x25   :  { %1489 = shalt.err (!%p1486_p1)
}
  0x26   :  { %81 = dma.hbm_to_vmem [thread:$0]  %s1982_s7, 1024, %s1709_s27, [#allocation8], %s1610_s21, %s1610_s21, %s1611_s22  }
  0x27   :  { %s1612_s20 = smov [#allocation10]   ;;  %s1613_s24 = smov [#allocation2]  }
  0x28   :  { %s103_s23 = sshll.u32 %s1612_s20, 4  ;;  %s35_s26 = sshll.u32 %s1613_s24, 4  ;;  %s104_s23 = int_to_ptr.vmem [resolvable:$true] %s103_s23  ;;  %s1746_s26 = int_to_ptr.vmem [resolvable:$true] %s35_s26 }
  0x29   :  { %s1490_s0 = scalar_lea.hbm %s1986_s11, 1024 }
  0x2a   :  { %p1491_p2 = scmp.ne.s32.totalorder %s1986_s11, %s1490_s0  ;;  %p1494_p3 = scmp.lt.u32.totalorder %s1490_s0, %s1986_s11 }
  0x2c   :  { %p1496_p4 = pnand %p1494_p3, %p1491_p2 }
  0x2e   :  { %1499 = shalt.err (!%p1496_p4)
}
  0x2f   :  { %s1500_s7 = scalar_lea.vmem %s104_s23, 1024  ;;  %p1505_p6 = scmp.lt.s32.totalorder %s104_s23, %s104_s23 }
  0x30   :  { %p1501_p5 = scmp.ne.s32.totalorder %s104_s23, %s1500_s7  ;;  %p1506_p7 = scmp.lt.s32.totalorder %s1500_s7, %s1500_s7 }
  0x32   :  { %p1507_p8 = por %p1506_p7, %p1505_p6 }
  0x34   :  { %p1508_p9 = pnand %p1507_p8, %p1501_p5 }
  0x36   :  { %1511 = shalt.err (!%p1508_p9)
}
  0x37   :  { %109 = dma.hbm_to_vmem [thread:$0]  %s1986_s11, 1024, %s104_s23, [#allocation11], %s1610_s21, %s1610_s21, %s1611_s22  }
  0x38   :  { %s1512_s24 = scalar_lea.hbm %s1977_s2, 1024 }
  0x39   :  { %p1513_p10 = scmp.ne.s32.totalorder %s1977_s2, %s1512_s24  ;;  %p1516_p11 = scmp.lt.u32.totalorder %s1512_s24, %s1977_s2 }
  0x3b   :  { %p1518_p12 = pnand %p1516_p11, %p1513_p10 }
  0x3d   :  { %1521 = shalt.err (!%p1518_p12)
}
  0x3e   :  { %s1522_s18 = scalar_lea.vmem %s1746_s26, 1024  ;;  %p1527_p0 = scmp.lt.s32.totalorder %s1746_s26, %s1746_s26 }
  0x3f   :  { %p1523_p13 = scmp.ne.s32.totalorder %s1746_s26, %s1522_s18  ;;  %p1528_p1 = scmp.lt.s32.totalorder %s1522_s18, %s1522_s18 }
  0x41   :  { %p1529_p2 = por %p1528_p1, %p1527_p0 }
  0x43   :  { %p1530_p3 = pnand %p1529_p2, %p1523_p13 }
  0x45   :  { %1533 = shalt.err (!%p1530_p3)
}
  0x46   :  { %41 = dma.hbm_to_vmem [thread:$0]  %s1977_s2, 1024, %s1746_s26, [#allocation3], %s1610_s21, %s1610_s21, %s1611_s22  }
  0x47   :  { %s1614_s19 = smov [#allocation6]   ;;  %s1615_s7 = smov [#allocation9]  }
  0x48   :  { %s61_s1 = sshll.u32 %s1614_s19, 4  ;;  %s89_s27 = sshll.u32 %s1615_s7, 4  ;;  %s62_s1 = int_to_ptr.vmem [resolvable:$true] %s61_s1  ;;  %s1783_s27 = int_to_ptr.vmem [resolvable:$true] %s89_s27 }
  0x49   :  { %s1534_s20 = scalar_lea.hbm %s1980_s5, 1024 }
  0x4a   :  { %p1535_p4 = scmp.ne.s32.totalorder %s1980_s5, %s1534_s20  ;;  %p1538_p5 = scmp.lt.u32.totalorder %s1534_s20, %s1980_s5 }
  0x4c   :  { %p1540_p6 = pnand %p1538_p5, %p1535_p4 }
  0x4e   :  { %1543 = shalt.err (!%p1540_p6)
}
  0x4f   :  { %s1544_s2 = scalar_lea.vmem %s62_s1, 1024  ;;  %p1549_p8 = scmp.lt.s32.totalorder %s62_s1, %s62_s1 }
  0x50   :  { %p1545_p7 = scmp.ne.s32.totalorder %s62_s1, %s1544_s2  ;;  %p1550_p9 = scmp.lt.s32.totalorder %s1544_s2, %s1544_s2 }
  0x52   :  { %p1551_p10 = por %p1550_p9, %p1549_p8 }
  0x54   :  { %p1552_p11 = pnand %p1551_p10, %p1545_p7 }
  0x56   :  { %1555 = shalt.err (!%p1552_p11)
}
  0x57   :  { %67 = dma.hbm_to_vmem [thread:$0]  %s1980_s5, 1024, %s62_s1, [#allocation5], %s1610_s21, %s1610_s21, %s1611_s22  }
  0x58   :  { %s1556_s23 = scalar_lea.hbm %s1984_s9, 1024 }
  0x59   :  { %p1557_p12 = scmp.ne.s32.totalorder %s1984_s9, %s1556_s23  ;;  %p1560_p13 = scmp.lt.u32.totalorder %s1556_s23, %s1984_s9 }
  0x5b   :  { %p1562_p0 = pnand %p1560_p13, %p1557_p12 }
  0x5d   :  { %1565 = shalt.err (!%p1562_p0)
}
  0x5e   :  { %s1566_s20 = scalar_lea.vmem %s1783_s27, 1024  ;;  %p1571_p2 = scmp.lt.s32.totalorder %s1783_s27, %s1783_s27 }
  0x5f   :  { %p1567_p1 = scmp.ne.s32.totalorder %s1783_s27, %s1566_s20  ;;  %p1572_p3 = scmp.lt.s32.totalorder %s1566_s20, %s1566_s20 }
  0x61   :  { %p1573_p4 = por %p1572_p3, %p1571_p2 }
  0x63   :  { %p1574_p5 = pnand %p1573_p4, %p1567_p1 }
  0x65   :  { %1577 = shalt.err (!%p1574_p5)
}
  0x66   :  { %95 = dma.hbm_to_vmem [thread:$0]  %s1984_s9, 1024, %s1783_s27, [#allocation8], %s1610_s21, %s1610_s21, %s1611_s22  }
  0x67   :  { %s1616_s24 = smov [#allocation12]   ;;  %s1578_s2 = scalar_lea.hbm %s1990_s15, 1024 }
  0x68   :  { %s121_s28 = sshll.u32 %s1616_s24, 4  ;;  %p1579_p6 = scmp.ne.s32.totalorder %s1990_s15, %s1578_s2  ;;  %s122_s28 = int_to_ptr.vmem [resolvable:$true] %s121_s28 }
  0x69   :  { %p1582_p7 = scmp.lt.u32.totalorder %s1578_s2, %s1990_s15 }
  0x6b   :  { %p1584_p8 = pnand %p1582_p7, %p1579_p6 }
  0x6d   :  { %1587 = shalt.err (!%p1584_p8)
}
  0x6e   :  { %s1588_s23 = scalar_lea.vmem %s122_s28, 1024  ;;  %p1593_p10 = scmp.lt.s32.totalorder %s122_s28, %s122_s28 }
  0x6f   :  { %p1589_p9 = scmp.ne.s32.totalorder %s122_s28, %s1588_s23  ;;  %p1594_p11 = scmp.lt.s32.totalorder %s1588_s23, %s1588_s23 }
  0x71   :  { %p1595_p12 = por %p1594_p11, %p1593_p10 }
  0x73   :  { %p1596_p13 = pnand %p1595_p12, %p1589_p9 }
  0x75   :  { %1599 = shalt.err (!%p1596_p13)
}
  0x76   :  { %127 = dma.hbm_to_vmem [thread:$0]  %s1990_s15, 1024, %s122_s28, [#allocation11], %s1610_s21, %s1610_s21, %s1611_s22  }
  0x77   :  { %1600 = dma.done.wait [#allocation3], 1024  }
  0x78   :  { %1601 = vsyncadd [#allocation3], 4294966272 }
  0x79   :  { %1602 = dma.done.wait [#allocation5], 2048  }
  0x7a   :  { %1603 = vsyncadd [#allocation5], 4294965248 }
  0x7b   :  { %1604 = dma.done.wait [#allocation8], 2048  }
  0x7c   :  { %1605 = vsyncadd [#allocation8], 4294965248 }
  0x7d   :  { %1606 = dma.done.wait [#allocation11], 2048  }
  0x7e   :  { %1607 = vsyncadd [#allocation11], 4294965248  ;;  %v1617_v0 = vmov 0.0   ;;  %vm1618_vm0 = vmmov 0   ;;  %v1378_v1 = vld [vmem:[#allocation2] sm:$0xff]   ;;  %v1379_v2 = vld [vmem:[#allocation2 + $0x8] sm:$0xff]  }
  0x7f   :  { %1207 = vmatprep.subr.bf16.mxu0 %v1617_v0  ;;  %1223 = vmatprep.mubr.msk.bf16.mxu0 %vm1618_vm0, %v1617_v0  ;;  %v1380_v3 = vld [vmem:[#allocation2 + $0x10] sm:$0xff]   ;;  %v1381_v4 = vld [vmem:[#allocation2 + $0x18] sm:$0xff]   ;;  %v1387_v5 = vld [vmem:[#allocation6] sm:$0xff]   ;;  %s1995_s22 = sld [smem:[#allocation18_spill]]  ;;  %s1996_s4 = sld [smem:[#allocation17_spill]] }
  0x80   :  { %1227 = vmatprep.subr.bf16.mxu1 %v1617_v0  ;;  %1243 = vmatprep.mubr.msk.bf16.mxu1 %vm1618_vm0, %v1617_v0  ;;  %v1389_v6 = vld [vmem:[#allocation6 + $0x8] sm:$0xff]   ;;  %v1382_v7 = vld [vmem:[#allocation2 + $0x20] sm:$0xff]   ;;  %v1391_v8 = vld [vmem:[#allocation6 + $0x10] sm:$0xff]  }
  0x81   :  { %1208 = vmatpush3.bf16.msra.mxu0 %v1378_v1  ;;  %1228 = vmatpush3.bf16.msra.mxu1 %v1387_v5  ;;  %v1383_v9 = vld [vmem:[#allocation2 + $0x28] sm:$0xff]   ;;  %v1393_v10 = vld [vmem:[#allocation6 + $0x18] sm:$0xff]   ;;  %v1384_v11 = vld [vmem:[#allocation2 + $0x30] sm:$0xff]  }
  0x82   :  { %1209 = vmatprep.subr.bf16.mxu0 %v1617_v0  ;;  %1229 = vmatprep.subr.bf16.mxu1 %v1617_v0  ;;  %v1395_v12 = vld [vmem:[#allocation6 + $0x20] sm:$0xff]   ;;  %v1385_v13 = vld [vmem:[#allocation2 + $0x38] sm:$0xff]   ;;  %v1397_v15 = vld [vmem:[#allocation6 + $0x28] sm:$0xff]  }
  0x83   :  { %v1386_v16 = vld [vmem:[#allocation4] sm:$0xff]   ;;  %v1399_v18 = vld [vmem:[#allocation6 + $0x30] sm:$0xff]   ;;  %v1388_v19 = vld [vmem:[#allocation4 + $0x8] sm:$0xff]  }
  0x84   :  { %v1390_v20 = vld [vmem:[#allocation4 + $0x10] sm:$0xff]   ;;  %v1392_v21 = vld [vmem:[#allocation4 + $0x18] sm:$0xff]   ;;  %v1394_v22 = vld [vmem:[#allocation4 + $0x20] sm:$0xff]  }
  0x85   :  { %1210 = vmatpush3.bf16.msra.mxu0 %v1379_v2  ;;  %1230 = vmatpush3.bf16.msra.mxu1 %v1389_v6  ;;  %v154_v14 = vld [vmem:[%s1995_s22] sm:$0xff]  ;;  %v1396_v23 = vld [vmem:[#allocation4 + $0x28] sm:$0xff]   ;;  %v1398_v24 = vld [vmem:[#allocation4 + $0x30] sm:$0xff]  }
  0x86   :  { %1211 = vmatprep.subr.bf16.mxu0 %v1617_v0  ;;  %1231 = vmatprep.subr.bf16.mxu1 %v1617_v0  ;;  %v155_v17 = vpack.c.bf16 %v154_v14, %v154_v14  ;;  %v1400_v25 = vld [vmem:[#allocation4 + $0x38] sm:$0xff]   ;;  %v1402_v34 = vld [vmem:[#allocation7] sm:$0xff]   ;;  %v1403_v37 = vld [vmem:[#allocation7 + $0x8] sm:$0xff]  }
  0x87   :  { %v1872_v26 = vld [vmem:[%s1996_s4] sm:$0xff]  ;;  %v1404_v38 = vld [vmem:[#allocation7 + $0x10] sm:$0xff]   ;;  %v1406_v40 = vld [vmem:[#allocation7 + $0x20] sm:$0xff]  }
  0x88   :  { %v1401_v27 = vld [vmem:[#allocation6 + $0x38] sm:$0xff]   ;;  %v153_v28 = vpack.c.bf16 %v1872_v26, %v1872_v26  ;;  %v1407_v41 = vld [vmem:[#allocation7 + $0x28] sm:$0xff]   ;;  %v1408_v46 = vld [vmem:[#allocation7 + $0x30] sm:$0xff]  }
  0x89   :  { %1212 = vmatpush3.bf16.msra.mxu0 %v1380_v3  ;;  %1232 = vmatpush3.bf16.msra.mxu1 %v1391_v8  ;;  %v1064_v29 = vld [vmem:[%s1978_s3] ss:$0 sm:$0xff]  ;;  %v1410_v48 = vld [vmem:[#allocation9] sm:$0xff]   ;;  %v1411_v49 = vld [vmem:[#allocation9 + $0x8] sm:$0xff]  }
  0x8a   :  { %1213 = vmatprep.subr.bf16.mxu0 %v1617_v0  ;;  %1233 = vmatprep.subr.bf16.mxu1 %v1617_v0  ;;  %v1405_v39 = vld [vmem:[#allocation7 + $0x18] sm:$0xff]   ;;  %v1412_v50 = vld [vmem:[#allocation9 + $0x10] sm:$0xff]   ;;  %v1414_v52 = vld [vmem:[#allocation9 + $0x20] sm:$0xff]  }
  0x8b   :  { %v1409_v47 = vld [vmem:[#allocation7 + $0x38] sm:$0xff]   ;;  %v1415_v53 = vld [vmem:[#allocation9 + $0x28] sm:$0xff]   ;;  %v1416_v63 = vld [vmem:[#allocation9 + $0x30] sm:$0xff]  }
  0x8c   :  { %v1413_v51 = vld [vmem:[#allocation9 + $0x18] sm:$0xff]   ;;  %v1418_v2 = vld [vmem:[#allocation10] sm:$0xff]   ;;  %v1419_v3 = vld [vmem:[#allocation10 + $0x8] sm:$0xff]  }
  0x8d   :  { %1214 = vmatpush3.bf16.msra.mxu0 %v1381_v4  ;;  %1234 = vmatpush3.bf16.msra.mxu1 %v1393_v10  ;;  %v1089_v55 = vld [vmem:[%s1981_s6] ss:$0 sm:$0xff]  ;;  %v1420_v4 = vld [vmem:[#allocation10 + $0x10] sm:$0xff]   ;;  %v1422_v6 = vld [vmem:[#allocation10 + $0x20] sm:$0xff]  }
  0x8e   :  { %1215 = vmatprep.subr.bf16.mxu0 %v1617_v0  ;;  %1235 = vmatprep.subr.bf16.mxu1 %v1617_v0  ;;  %v1417_v1 = vld [vmem:[#allocation9 + $0x38] sm:$0xff]  }
  0x8f   :  { %v1421_v5 = vld [vmem:[#allocation10 + $0x18] sm:$0xff]  }
  0x90   :  { %v1090_v8 = vld [vmem:[%s1983_s8] ss:$0 sm:$0xff] }
  0x91   :  { %1216 = vmatpush3.bf16.msra.mxu0 %v1382_v7  ;;  %1236 = vmatpush3.bf16.msra.mxu1 %v1395_v12  ;;  %v1423_v7 = vld [vmem:[#allocation10 + $0x28] sm:$0xff]  }
  0x92   :  { %1217 = vmatprep.subr.bf16.mxu0 %v1617_v0  ;;  %1237 = vmatprep.subr.bf16.mxu1 %v1617_v0 }
  0x95   :  { %1218 = vmatpush3.bf16.msra.mxu0 %v1383_v9  ;;  %1238 = vmatpush3.bf16.msra.mxu1 %v1397_v15 }
  0x96   :  { %1219 = vmatprep.subr.bf16.mxu0 %v1617_v0  ;;  %1239 = vmatprep.subr.bf16.mxu1 %v1617_v0 }
  0x99   :  { %1220 = vmatpush3.bf16.msra.mxu0 %v1384_v11  ;;  %1240 = vmatpush3.bf16.msra.mxu1 %v1399_v18  ;;  %v1426_v18 = vld [vmem:[%s1988_s13] sm:$0xff]  }
  0x9a   :  { %1221 = vmatprep.subr.bf16.mxu0 %v1617_v0  ;;  %1241 = vmatprep.subr.bf16.mxu1 %v1617_v0 }
  0x9d   :  { %1222 = vmatpush3.bf16.msra.mxu0 %v1385_v13  ;;  %1242 = vmatpush3.bf16.msra.mxu1 %v1401_v27 }
  0x9e   :  { %1247 = vmatprep.subr.bf16.mxu0 %v1617_v0  ;;  %1267 = vmatprep.subr.bf16.mxu1 %v1617_v0 }
  0xa0   :  { %1224 = vmatmul.mubr.bf16.vlgmr.msra.gmra.mrb[0].mxu0 %v155_v17  ;;  %v1425_v17 = vld [vmem:[#allocation10 + $0x38] sm:$0xff]  }
  0xa1   :  { %1248 = vmatpush3.bf16.msra.mxu0 %v1386_v16  ;;  %1263 = vmatprep.mubr.msk.bf16.mxu0 %vm1618_vm0, %v1617_v0  ;;  %v1424_v16 = vld [vmem:[#allocation10 + $0x30] sm:$0xff]  }
  0xa2   :  { %1249 = vmatprep.subr.bf16.mxu0 %v1617_v0 }
  0xa5   :  { %1250 = vmatpush3.bf16.msra.mxu0 %v1388_v19  ;;  %v1428_v19 = vld [vmem:[%s1988_s13 + $0x8] sm:$0xff]  }
  0xa6   :  { %1251 = vmatprep.subr.bf16.mxu0 %v1617_v0 }
  0xa9   :  { %1252 = vmatpush3.bf16.msra.mxu0 %v1390_v20  ;;  %v1430_v20 = vld [vmem:[%s1988_s13 + $0x10] sm:$0xff]  }
  0xaa   :  { %1253 = vmatprep.subr.bf16.mxu0 %v1617_v0 }
  0xad   :  { %1254 = vmatpush3.bf16.msra.mxu0 %v1392_v21  ;;  %v1432_v21 = vld [vmem:[%s1988_s13 + $0x18] sm:$0xff]  }
  0xae   :  { %1255 = vmatprep.subr.bf16.mxu0 %v1617_v0 }
  0xb1   :  { %1256 = vmatpush3.bf16.msra.mxu0 %v1394_v22  ;;  %v1434_v22 = vld [vmem:[%s1988_s13 + $0x20] sm:$0xff]  }
  0xb2   :  { %1257 = vmatprep.subr.bf16.mxu0 %v1617_v0 }
  0xb5   :  { %1258 = vmatpush3.bf16.msra.mxu0 %v1396_v23  ;;  %v1436_v23 = vld [vmem:[%s1988_s13 + $0x28] sm:$0xff]  }
  0xb6   :  { %1259 = vmatprep.subr.bf16.mxu0 %v1617_v0 }
  0xb9   :  { %1260 = vmatpush3.bf16.msra.mxu0 %v1398_v24  ;;  %v1099_v24 = vld [vmem:[%s1985_s10] ss:$0 sm:$0xff] }
  0xba   :  { %1261 = vmatprep.subr.bf16.mxu0 %v1617_v0 }
  0xbd   :  { %1262 = vmatpush3.bf16.msra.mxu0 %v1400_v25 }
  0xbe   :  { %1287 = vmatprep.subr.bf16.mxu0 %v1617_v0 }
  0xc0   :  { %1264 = vmatmul.mubr.bf16.vlgmr.msra.gmra.mrb[4].mxu0 %v153_v28 }
  0xc1   :  { %1303 = vmatprep.mubr.msk.bf16.mxu0 %vm1618_vm0, %v1617_v0  ;;  %1288 = vmatpush3.bf16.msra.mxu0 %v1410_v48 }
  0xc2   :  { %1289 = vmatprep.subr.bf16.mxu0 %v1617_v0 }
  0xc5   :  { %1290 = vmatpush3.bf16.msra.mxu0 %v1411_v49 }
  0xc6   :  { %1291 = vmatprep.subr.bf16.mxu0 %v1617_v0 }
  0xc9   :  { %1292 = vmatpush3.bf16.msra.mxu0 %v1412_v50 }
  0xca   :  { %1293 = vmatprep.subr.bf16.mxu0 %v1617_v0 }
  0xcd   :  { %1294 = vmatpush3.bf16.msra.mxu0 %v1413_v51 }
  0xce   :  { %1295 = vmatprep.subr.bf16.mxu0 %v1617_v0 }
  0xd1   :  { %1296 = vmatpush3.bf16.msra.mxu0 %v1414_v52 }
  0xd2   :  { %1297 = vmatprep.subr.bf16.mxu0 %v1617_v0 }
  0xd5   :  { %1298 = vmatpush3.bf16.msra.mxu0 %v1415_v53 }
  0xd6   :  { %1299 = vmatprep.subr.bf16.mxu0 %v1617_v0 }
  0xd9   :  { %1300 = vmatpush3.bf16.msra.mxu0 %v1416_v63 }
  0xda   :  { %1301 = vmatprep.subr.bf16.mxu0 %v1617_v0 }
  0xdd   :  { %1302 = vmatpush3.bf16.msra.mxu0 %v1417_v1  ;;  %v1126_v1 = vld [vmem:[%s1991_s16] ss:$0 sm:$0xff] }
  0xde   :  { %1327 = vmatprep.subr.bf16.mxu0 %v1617_v0 }
 0x173   :  { %v261_v30 = vpop.f32.mrb[0].mxu0 }
 0x174   :  { %v262_v31 = vadd.f32 %v1064_v29, %v261_v30  ;;  %v1225_v32 = vpop.f32.mrb[1].mxu0 }
 0x175   :  { %v264_v33 = vpop.f32.mrb[2].mxu0  ;;  %v1427_v32 = vld [vmem:[#allocation12] sm:$0xff]  }
 0x176   :  { %v283_v35 = vpack.c.bf16 %v262_v31, %v262_v31  ;;  %v1226_v36 = vpop.f32.mrb[3].mxu0 }
 0x177   :  { %v1433_v36 = vld [vmem:[#allocation12 + $0x18] sm:$0xff]  }
 0x178   :  { %1244 = vmatmul.mubr.bf16.vlgmr.msra.gmra.mrb[0].mxu1 %v283_v35  ;;  %v1431_v35 = vld [vmem:[#allocation12 + $0x10] sm:$0xff]  }
 0x179   :  { %1268 = vmatpush3.bf16.msra.mxu1 %v1402_v34  ;;  %1283 = vmatprep.mubr.msk.bf16.mxu1 %vm1618_vm0, %v1617_v0  ;;  %v1429_v34 = vld [vmem:[#allocation12 + $0x8] sm:$0xff]  }
 0x17a   :  { %1269 = vmatprep.subr.bf16.mxu1 %v1617_v0 }
 0x17d   :  { %1270 = vmatpush3.bf16.msra.mxu1 %v1403_v37  ;;  %v1435_v37 = vld [vmem:[#allocation12 + $0x20] sm:$0xff]  }
 0x17e   :  { %1271 = vmatprep.subr.bf16.mxu1 %v1617_v0 }
 0x181   :  { %1272 = vmatpush3.bf16.msra.mxu1 %v1404_v38  ;;  %v1437_v38 = vld [vmem:[#allocation12 + $0x28] sm:$0xff]  }
 0x182   :  { %1273 = vmatprep.subr.bf16.mxu1 %v1617_v0 }
 0x185   :  { %1274 = vmatpush3.bf16.msra.mxu1 %v1405_v39  ;;  %v1438_v39 = vld [vmem:[%s1988_s13 + $0x30] sm:$0xff]  }
 0x186   :  { %1275 = vmatprep.subr.bf16.mxu1 %v1617_v0 }
 0x189   :  { %1276 = vmatpush3.bf16.msra.mxu1 %v1406_v40  ;;  %v1439_v40 = vld [vmem:[#allocation12 + $0x30] sm:$0xff]  }
 0x18a   :  { %1277 = vmatprep.subr.bf16.mxu1 %v1617_v0 }
 0x18d   :  { %1278 = vmatpush3.bf16.msra.mxu1 %v1407_v41  ;;  %v1440_v41 = vld [vmem:[%s1988_s13 + $0x38] sm:$0xff]  }
 0x18e   :  { %1279 = vmatprep.subr.bf16.mxu1 %v1617_v0 }
 0x191   :  { %1280 = vmatpush3.bf16.msra.mxu1 %v1408_v46 }
 0x192   :  { %1281 = vmatprep.subr.bf16.mxu1 %v1617_v0 }
 0x193   :  { %v470_v42 = vpop.f32.mrb[4].mxu0 }
 0x194   :  { %v1265_v43 = vpop.f32.mrb[5].mxu0 }
 0x195   :  { %v473_v44 = vpop.f32.mrb[6].mxu0  ;;  %1282 = vmatpush3.bf16.msra.mxu1 %v1409_v47  ;;  %v1108_v43 = vld [vmem:[%s1987_s12] ss:$0 sm:$0xff] }
 0x196   :  { %v1266_v45 = vpop.f32.mrb[7].mxu0  ;;  %1307 = vmatprep.subr.bf16.mxu1 %v1617_v0 }
 0x24b   :  { %v382_v54 = vpop.f32.mrb[0].mxu1 }
 0x24c   :  { %v471_v56 = vadd.f32 %v470_v42, %v382_v54  ;;  %v1245_v57 = vpop.f32.mrb[1].mxu1  ;;  %v1441_v42 = vld [vmem:[#allocation12 + $0x38] sm:$0xff]  }
 0x24d   :  { %v385_v58 = vpop.f32.mrb[2].mxu1 }
 0x24e   :  { %v483_v59 = vadd.f32 %v1089_v55, %v471_v56  ;;  %v1246_v60 = vpop.f32.mrb[3].mxu1 }
 0x250   :  { %v484_v61 = vmax.f32 %v483_v59, 0.0 }
 0x252   :  { %v485_v62 = vpack.c.bf16 %v484_v61, %v484_v61 }
 0x254   :  { %1284 = vmatmul.mubr.bf16.vlgmr.msra.gmra.mrb[4].mxu1 %v485_v62 }
 0x255   :  { %1323 = vmatprep.mubr.msk.bf16.mxu1 %vm1618_vm0, %v1617_v0  ;;  %1308 = vmatpush3.bf16.msra.mxu1 %v1418_v2 }
 0x256   :  { %1309 = vmatprep.subr.bf16.mxu1 %v1617_v0 }
 0x259   :  { %1310 = vmatpush3.bf16.msra.mxu1 %v1419_v3 }
 0x25a   :  { %1311 = vmatprep.subr.bf16.mxu1 %v1617_v0 }
 0x25d   :  { %1312 = vmatpush3.bf16.msra.mxu1 %v1420_v4 }
 0x25e   :  { %1313 = vmatprep.subr.bf16.mxu1 %v1617_v0 }
 0x261   :  { %1314 = vmatpush3.bf16.msra.mxu1 %v1421_v5 }
 0x262   :  { %1315 = vmatprep.subr.bf16.mxu1 %v1617_v0 }
 0x265   :  { %1316 = vmatpush3.bf16.msra.mxu1 %v1422_v6 }
 0x266   :  { %1317 = vmatprep.subr.bf16.mxu1 %v1617_v0 }
 0x269   :  { %1318 = vmatpush3.bf16.msra.mxu1 %v1423_v7 }
 0x26a   :  { %1319 = vmatprep.subr.bf16.mxu1 %v1617_v0 }
 0x26d   :  { %1320 = vmatpush3.bf16.msra.mxu1 %v1424_v16 }
 0x26e   :  { %1321 = vmatprep.subr.bf16.mxu1 %v1617_v0 }
 0x271   :  { %1322 = vmatpush3.bf16.msra.mxu1 %v1425_v17 }
 0x272   :  { %1347 = vmatprep.subr.bf16.mxu1 %v1617_v0 }
 0x327   :  { %v591_v9 = vpop.f32.mrb[4].mxu1 }
 0x328   :  { %v592_v10 = vadd.f32 %v1090_v8, %v591_v9  ;;  %v1285_v11 = vpop.f32.mrb[5].mxu1 }
 0x329   :  { %v594_v12 = vpop.f32.mrb[6].mxu1 }
 0x32a   :  { %v597_v13 = vmax.f32 %v592_v10, 0.0  ;;  %v1286_v14 = vpop.f32.mrb[7].mxu1 }
 0x32c   :  { %v598_v15 = vpack.c.bf16 %v597_v13, %v597_v13 }
 0x32e   :  { %1304 = vmatmul.mubr.bf16.vlgmr.msra.gmra.mrb[8].mxu0 %v598_v15 }
 0x32f   :  { %1343 = vmatprep.mubr.msk.bf16.mxu0 %vm1618_vm0, %v1617_v0  ;;  %1328 = vmatpush3.bf16.msra.mxu0 %v1426_v18 }
 0x330   :  { %1329 = vmatprep.subr.bf16.mxu0 %v1617_v0 }
 0x333   :  { %1330 = vmatpush3.bf16.msra.mxu0 %v1428_v19 }
 0x334   :  { %1331 = vmatprep.subr.bf16.mxu0 %v1617_v0 }
 0x337   :  { %1332 = vmatpush3.bf16.msra.mxu0 %v1430_v20 }
 0x338   :  { %1333 = vmatprep.subr.bf16.mxu0 %v1617_v0 }
 0x33b   :  { %1334 = vmatpush3.bf16.msra.mxu0 %v1432_v21 }
 0x33c   :  { %1335 = vmatprep.subr.bf16.mxu0 %v1617_v0 }
 0x33f   :  { %1336 = vmatpush3.bf16.msra.mxu0 %v1434_v22 }
 0x340   :  { %1337 = vmatprep.subr.bf16.mxu0 %v1617_v0 }
 0x343   :  { %1338 = vmatpush3.bf16.msra.mxu0 %v1436_v23 }
 0x344   :  { %1339 = vmatprep.subr.bf16.mxu0 %v1617_v0 }
 0x347   :  { %1340 = vmatpush3.bf16.msra.mxu0 %v1438_v39 }
 0x348   :  { %1341 = vmatprep.subr.bf16.mxu0 %v1617_v0 }
 0x34b   :  { %1342 = vmatpush3.bf16.msra.mxu0 %v1440_v41 }
 0x401   :  { %v704_v25 = vpop.f32.mrb[8].mxu0 }
 0x402   :  { %v705_v27 = vadd.f32 %v1099_v24, %v704_v25  ;;  %v1305_v28 = vpop.f32.mrb[9].mxu0 }
 0x403   :  { %v707_v29 = vpop.f32.mrb[10].mxu0 }
 0x404   :  { %v710_v30 = vmax.f32 %v705_v27, 0.0  ;;  %v1306_v31 = vpop.f32.mrb[11].mxu0 }
 0x406   :  { %v711_v33 = vpack.c.bf16 %v710_v30, %v710_v30 }
 0x408   :  { %1324 = vmatmul.mubr.bf16.vlgmr.msra.gmra.mrb[8].mxu1 %v711_v33 }
 0x409   :  { %1348 = vmatpush3.bf16.msra.mxu1 %v1427_v32  ;;  %1363 = vmatprep.mubr.msk.bf16.mxu1 %vm1618_vm0, %v1617_v0 }
 0x40a   :  { %1349 = vmatprep.subr.bf16.mxu1 %v1617_v0 }
 0x40d   :  { %1350 = vmatpush3.bf16.msra.mxu1 %v1429_v34 }
 0x40e   :  { %1351 = vmatprep.subr.bf16.mxu1 %v1617_v0 }
 0x411   :  { %1352 = vmatpush3.bf16.msra.mxu1 %v1431_v35 }
 0x412   :  { %1353 = vmatprep.subr.bf16.mxu1 %v1617_v0 }
 0x415   :  { %1354 = vmatpush3.bf16.msra.mxu1 %v1433_v36 }
 0x416   :  { %1355 = vmatprep.subr.bf16.mxu1 %v1617_v0 }
 0x419   :  { %1356 = vmatpush3.bf16.msra.mxu1 %v1435_v37 }
 0x41a   :  { %1357 = vmatprep.subr.bf16.mxu1 %v1617_v0 }
 0x41d   :  { %1358 = vmatpush3.bf16.msra.mxu1 %v1437_v38 }
 0x41e   :  { %1359 = vmatprep.subr.bf16.mxu1 %v1617_v0 }
 0x421   :  { %1360 = vmatpush3.bf16.msra.mxu1 %v1439_v40 }
 0x422   :  { %1361 = vmatprep.subr.bf16.mxu1 %v1617_v0  ;;  %v1117_v0 = vld [vmem:[%s1989_s14] ss:$0 sm:$0xff] }
 0x425   :  { %1362 = vmatpush3.bf16.msra.mxu1 %v1441_v42 }
 0x4db   :  { %v817_v44 = vpop.f32.mrb[8].mxu1 }
 0x4dc   :  { %v818_v45 = vadd.f32 %v1108_v43, %v817_v44  ;;  %v1325_v46 = vpop.f32.mrb[9].mxu1 }
 0x4dd   :  { %v820_v47 = vpop.f32.mrb[10].mxu1 }
 0x4de   :  { %v823_v48 = vmax.f32 %v818_v45, 0.0  ;;  %v1326_v49 = vpop.f32.mrb[11].mxu1 }
 0x4e0   :  { %v824_v50 = vpack.c.bf16 %v823_v48, %v823_v48 }
 0x4e2   :  { %1344 = vmatmul.mubr.bf16.vlgmr.msra.gmra.mrb[12].mxu0 %v824_v50  ;;  %1364 = vmatmul.mubr.bf16.vlgmr.msra.gmra.mrb[12].mxu1 %v824_v50 }
 0x5b5   :  { %v930_v51 = vpop.f32.mrb[12].mxu0  ;;  %v1041_v52 = vpop.f32.mrb[12].mxu1 }
 0x5b6   :  { %v931_v53 = vadd.f32 %v1117_v0, %v930_v51  ;;  %v1345_v54 = vpop.f32.mrb[13].mxu0  ;;  %v1365_v55 = vpop.f32.mrb[13].mxu1  ;;  %v1042_v2 = vadd.f32 %v1126_v1, %v1041_v52 }
 0x5b7   :  { %v933_v56 = vpop.f32.mrb[14].mxu0  ;;  %v1044_v57 = vpop.f32.mrb[14].mxu1 }
 0x5b8   :  { %v1047_v58 = vsub.f32 0.0, %v931_v53  ;;  %v1346_v59 = vpop.f32.mrb[15].mxu0  ;;  %v1366_v60 = vpop.f32.mrb[15].mxu1  ;;  %v1052_v3 = vsub.f32 %v1042_v2, %v1872_v26 }
 0x5ba   :  { %v1048_v61 = vmul.f32 1.442695, %v1047_v58 }
 0x5bc   :  { %1442 = vpow2.f32 %v1048_v61 }
 0x5c6   :  { %v1443_v62 = vpop.eup %1442 }
 0x5c7   :  { %v1050_v63 = vadd.f32 1.0, %v1443_v62 }
 0x5c9   :  { %1444 = vrcp.f32 %v1050_v63 }
 0x5d3   :  { %v1445_v4 = vpop.eup %1444 }
 0x5d4   :  { %v1053_v5 = vmul.f32 %v1445_v4, %v1052_v3 }
 0x5d6   :  { %v1054_v6 = vadd.f32 %v1053_v5, %v1872_v26 }
 0x5d8   :  { %1055 = vst [vmem:[%s1992_s17] sm:$0xff] %v1054_v6 }
 0x5d9   :  { %1060 = vsyncpa [#allocation3], 1 }
 0x5da   :  { %1061 = vsyncpa [#allocation5], 1 }
 0x5db   :  { %1062 = vsyncpa [#allocation8], 1 }
 0x5dc   :  { %1063 = vsyncpa [#allocation11], 1 }

</bundles_post_ra>
